<compile_context>
chip_gen: v7x
topology: tpu7x:2x2x1
jax: 0.10.0
libtpu: 0.0.40
codegen_flags: <defaults>
</compile_context>

<pallas_src>
import functools

import jax
import jax.numpy as jnp
from jax.experimental import pallas as pl
from jax.experimental.pallas import tpu as pltpu


def _round_up(x: int, m: int) -> int:
    return ((x + m - 1) // m) * m


def _custom_mu_kernel(
    feat_ref, left_ref, right_ref,
    w1_ref, b1_ref, w2_ref, ln_g_ref, ln_b_ref,
    out_ref,
    *, training: bool, embed_dim: int, img_dim: int, ln_eps: float = 1e-5,
):
    # ----- fused first layer (both branches): one MXU matmul + one tanh -----
    h = jnp.tanh(
        jnp.dot(feat_ref[...], w1_ref[...], preferred_element_type=jnp.float32)
        + b1_ref[...]
    )                                                            # (TB, 2H) f32

    # ----- fused second layer: z[:, :E] = embed_pre_LN, z[:, E:E+D] = a0-a1 ---
    z = jnp.dot(h.astype(w2_ref.dtype), w2_ref[...],
                preferred_element_type=jnp.float32)              # (TB, 128) f32
    e = z[:, :embed_dim]                                         # (TB, E)
    d = z[:, embed_dim:embed_dim + img_dim]                      # (TB, D) lane-replicated

    # ----- LayerNorm(E): one-pass stats (two independent XLU reduces) --------
    inv_e = 1.0 / embed_dim
    mean = jnp.sum(e, axis=-1, keepdims=True) * inv_e
    mean_sq = jnp.sum(e * e, axis=-1, keepdims=True) * inv_e
    var = mean_sq - mean * mean                # biased variance, like torch LN
    e = (e - mean) * jax.lax.rsqrt(var + ln_eps) * ln_g_ref[...] + ln_b_ref[...]

    # ----- mixture over the two image-feature streams (f32 elementwise) ------
    left = left_ref[...].astype(jnp.float32)
    right = right_ref[...].astype(jnp.float32)
    if training:
        # softmax([a0, a1])[0] == sigmoid(a0 - a1); sigmoid runs in the EUP slot.
        s = jax.nn.sigmoid(d)
        img = right + s * (left - right)
    else:
        # argmax over 2 logits; tie (a0 == a1) -> index 0 (left), like torch.
        img = jnp.where(d >= 0.0, left, right)

    # ----- lane-dense padded output; direct sub-slab stores (no concat) ------
    out_ref[:, :img_dim] = img.astype(out_ref.dtype)
    out_ref[:, img_dim:img_dim + embed_dim] = e.astype(out_ref.dtype)
    pad = out_ref.shape[1] - (img_dim + embed_dim)
    if pad > 0:
        out_ref[:, img_dim + embed_dim:] = jnp.zeros(
            (out_ref.shape[0], pad), out_ref.dtype)


def fuse_custom_mu_params(params, *, img_dim: int, compute_dtype=jnp.bfloat16):
    """One-time structural fusion of the raw (in,out)-layout parameters.

    Raw params: wa1 (F,H), ba1 (1,H), wa2 (H,2), we1 (F,H), be1 (1,H),
                we2 (H,E), ln_g (1,E), ln_b (1,E)
    """
    pdt = params["we2"].dtype
    H = params["wa1"].shape[1]
    E = params["we2"].shape[1]
    D = img_dim

    # First layers side by side -> one (F, 2H) matmul for both branches.
    w1 = jnp.concatenate([params["wa1"], params["we1"]], axis=1)          # (F, 2H)
    b1 = jnp.concatenate([params["ba1"], params["be1"]], axis=1)          # (1, 2H)

    # Second layers as one block matrix; alpha branch reduced to the logit
    # difference a0 - a1, replicated across D lanes so the kernel never
    # extracts/broadcasts a single lane before the blend.
    wa2_diff = params["wa2"][:, 0:1] - params["wa2"][:, 1:2]              # (H, 1)
    w2_alpha = jnp.concatenate(
        [jnp.zeros((H, E), pdt), jnp.tile(wa2_diff, (1, D))], axis=1)     # (H, E+D)
    w2_embed = jnp.concatenate(
        [params["we2"], jnp.zeros((H, D), pdt)], axis=1)                  # (H, E+D)
    w2 = jnp.concatenate([w2_alpha, w2_embed], axis=0)                    # (2H, E+D)

    # Pad output columns to a lane-dense multiple of 128 (extra MXU cols free).
    cols = _round_up(E + D, 128)
    if cols > E + D:
        w2 = jnp.concatenate([w2, jnp.zeros((2 * H, cols - (E + D)), pdt)], axis=1)

    return {
        "w1": w1.astype(compute_dtype),
        "b1": b1.astype(jnp.float32),           # bias / LN params stay f32
        "w2": w2.astype(compute_dtype),
        "ln_g": params["ln_g"].astype(jnp.float32),
        "ln_b": params["ln_b"].astype(jnp.float32),
    }


def custom_mu_forward(features, left_img, right_img, fused, *,
                      training: bool = True, block_b: int | None = None):
    B, F_IN = features.shape
    D = left_img.shape[1]
    E = fused["ln_g"].shape[1]
    H2 = fused["w1"].shape[1]            # 2H
    W2C = fused["w2"].shape[1]           # round_up(E + D, 128)
    OUT = D + E
    OUT_PAD = _round_up(OUT, 128)
    compute_dtype = fused["w1"].dtype
    itemsize = jnp.dtype(compute_dtype).itemsize

    # Batch tile: multiple of 8 sublanes; >=512 is the target for large B
    # (sweep 512-4096); tiny batches stay a single step.
    if block_b is None:
        block_b = min(_round_up(B, 8), 1024)
    TB = _round_up(block_b, 8)
    n_tiles = pl.cdiv(B, TB)
    B_pad = n_tiles * TB

    def prep(x):
        x = x.astype(compute_dtype)
        if B_pad > B:
            x = jnp.pad(x, ((0, B_pad - B), (0, 0)))
        return x

    feats = prep(features)
    left = prep(left_img)
    right = prep(right_img)

    kernel = functools.partial(_custom_mu_kernel, training=training,
                               embed_dim=E, img_dim=D)

    # VMEM budget: double-buffered batch-blocked I/O + resident weights, 2x
    # headroom, clipped to v7x's 64 MiB physical VMEM.
    tile_bytes = 2 * TB * ((F_IN + 2 * D) * itemsize + OUT_PAD * 4)
    weight_bytes = ((fused["w1"].size + fused["w2"].size) * itemsize
                    + 4 * (fused["b1"].size + fused["ln_g"].size + fused["ln_b"].size))
    vmem_limit = int(min(64 * 1024 * 1024,
                         max(16 * 1024 * 1024, 2 * (tile_bytes + weight_bytes))))

    flops = (2 * B_pad * F_IN * H2            # fused first layer
             + 2 * B_pad * H2 * W2C           # fused second layer
             + 12 * B_pad * (D + E))          # LayerNorm + blend epilogue
    transcendentals = B_pad * H2 + B_pad * D  # tanh + sigmoid
    bytes_accessed = int(
        itemsize * (feats.size + left.size + right.size
                    + fused["w1"].size + fused["w2"].size)
        + 4 * (fused["b1"].size + fused["ln_g"].size + fused["ln_b"].size
               + B_pad * OUT_PAD))

    out = pl.pallas_call(
        kernel,
        out_shape=jax.ShapeDtypeStruct((B_pad, OUT_PAD), jnp.float32),
        grid=(n_tiles,),
        in_specs=[
            pl.BlockSpec((TB, F_IN), lambda i: (i, 0)),     # features (batch-blocked)
            pl.BlockSpec((TB, D), lambda i: (i, 0)),        # left
            pl.BlockSpec((TB, D), lambda i: (i, 0)),        # right
            pl.BlockSpec((F_IN, H2), lambda i: (0, 0)),     # w1   (resident)
            pl.BlockSpec((1, H2), lambda i: (0, 0)),        # b1   (resident)
            pl.BlockSpec((H2, W2C), lambda i: (0, 0)),      # w2   (resident)
            pl.BlockSpec((1, E), lambda i: (0, 0)),         # ln_g (resident)
            pl.BlockSpec((1, E), lambda i: (0, 0)),         # ln_b (resident)
        ],
        out_specs=pl.BlockSpec((TB, OUT_PAD), lambda i: (i, 0)),
        compiler_params=pltpu.CompilerParams(
            dimension_semantics=("parallel",),   # v7x: 2 TCs split the batch grid
            vmem_limit_bytes=vmem_limit),
        cost_estimate=pl.CostEstimate(
            flops=flops, transcendentals=transcendentals,
            bytes_accessed=bytes_accessed),
    )(feats, left, right, fused["w1"], fused["b1"], fused["w2"],
      fused["ln_g"], fused["ln_b"])

    # Strip the batch padding and the lane padding.
    return out[:B, :OUT]


def _reference_forward(features, left_img, right_img, p, training=True):
    """Pure-JAX reference using the ORIGINAL (unfused) f32 parameters."""
    h_a = jnp.tanh(features @ p["wa1"] + p["ba1"])
    alpha = h_a @ p["wa2"]
    h_e = jnp.tanh(features @ p["we1"] + p["be1"])
    e = h_e @ p["we2"]
    mu = jnp.mean(e, axis=-1, keepdims=True)
    var = jnp.mean((e - mu) ** 2, axis=-1, keepdims=True)
    e = (e - mu) * jax.lax.rsqrt(var + 1e-5) * p["ln_g"] + p["ln_b"]
    if training:
        w = jax.nn.softmax(alpha, axis=1)
        img = w[:, 0:1] * left_img + w[:, 1:2] * right_img
    else:
        img = jnp.where(alpha[:, 0:1] >= alpha[:, 1:2], left_img, right_img)
    return jnp.concatenate([img, e], axis=1)


if __name__ == "__main__":
    # net_arch = [[F, H, 2], [F, H, E]] with activation_fn = nn.Tanh
    B, F_IN, H, E, D = 8, 32, 32, 32, 16

    key = jax.random.PRNGKey(0)
    ks = jax.random.split(key, 9)

    features = jax.random.normal(ks[0], (B, F_IN), jnp.float32)
    left_img = jax.random.normal(ks[1], (B, D), jnp.float32)
    right_img = jax.random.normal(ks[2], (B, D), jnp.float32)

    scale = 0.1
    raw_params = {
        # alpha MLP:  F -> H (bias) -> 2 (no bias)
        "wa1": scale * jax.random.normal(ks[3], (F_IN, H), jnp.float32),
        "ba1": scale * jax.random.normal(ks[4], (1, H), jnp.float32),
        "wa2": scale * jax.random.normal(ks[5], (H, 2), jnp.float32),
        # embed MLP:  F -> H (bias) -> E (no bias) -> LayerNorm(E)
        "we1": scale * jax.random.normal(ks[6], (F_IN, H), jnp.float32),
        "be1": scale * jax.random.normal(ks[7], (1, H), jnp.float32),
        "we2": scale * jax.random.normal(ks[8], (H, E), jnp.float32),
        "ln_g": jnp.ones((1, E), jnp.float32),   # torch LayerNorm defaults
        "ln_b": jnp.zeros((1, E), jnp.float32),
    }

    # ---------- f32 compute path: tight check against the naive reference ----
    fused_f32 = fuse_custom_mu_params(raw_params, img_dim=D,
                                      compute_dtype=jnp.float32)

    out_tr = jax.block_until_ready(
        custom_mu_forward(features, left_img, right_img, fused_f32, training=True))
    ref_tr = _reference_forward(features, left_img, right_img, raw_params, training=True)
    assert out_tr.shape == (B, D + E)
    assert jnp.allclose(out_tr, ref_tr, atol=1e-4, rtol=1e-4), "f32 train mismatch"

    out_ev = jax.block_until_ready(
        custom_mu_forward(features, left_img, right_img, fused_f32, training=False))
    ref_ev = _reference_forward(features, left_img, right_img, raw_params, training=False)
    assert jnp.allclose(out_ev, ref_ev, atol=1e-4, rtol=1e-4), "f32 eval mismatch"

    # ---------- multi-tile grid + batch padding (B not a multiple of TB) -----
    B2 = 13
    k2 = jax.random.split(jax.random.PRNGKey(1), 3)
    f2 = jax.random.normal(k2[0], (B2, F_IN), jnp.float32)
    l2 = jax.random.normal(k2[1], (B2, D), jnp.float32)
    r2 = jax.random.normal(k2[2], (B2, D), jnp.float32)
    out2 = jax.block_until_ready(
        custom_mu_forward(f2, l2, r2, fused_f32, training=True, block_b=8))
    ref2 = _reference_forward(f2, l2, r2, raw_params, training=True)
    assert out2.shape == (B2, D + E)
    assert jnp.allclose(out2, ref2, atol=1e-4, rtol=1e-4), "multi-tile mismatch"

    # ---------- bf16 compute path (the fast/HBM-halving path) ----------------
    fused_bf16 = fuse_custom_mu_params(raw_params, img_dim=D,
                                       compute_dtype=jnp.bfloat16)

    out_tr_bf = jax.block_until_ready(
        custom_mu_forward(features, left_img, right_img, fused_bf16, training=True))
    assert out_tr_bf.shape == (B, D + E)
    # bf16 matmul inputs + LayerNorm gain => ~1e-2 level deviations vs f32 ref.
    assert jnp.allclose(out_tr_bf, ref_tr, atol=1e-1, rtol=1e-1), "bf16 train mismatch"

    out_ev_bf = jax.block_until_ready(
        custom_mu_forward(features, left_img, right_img, fused_bf16, training=False))
    # Eval is a hard select: every image row must match (bf16-rounded) left or
    # right; near-ties may legitimately flip under bf16, so check membership.
    img_bf = out_ev_bf[:, :D]
    tol = 2e-2 + 1e-2 * jnp.maximum(jnp.abs(left_img), jnp.abs(right_img))
    is_left = jnp.all(jnp.abs(img_bf - left_img) <= tol, axis=1)
    is_right = jnp.all(jnp.abs(img_bf - right_img) <= tol, axis=1)
    assert bool(jnp.all(is_left | is_right)), "bf16 eval image not a hard select"
    assert jnp.allclose(out_ev_bf[:, D:], ref_ev[:, D:], atol=1e-1), "bf16 eval embed mismatch"

    print("KERNEL_OK")
</pallas_src>

<mosaic_0001>
module attributes {stable_mosaic.version = 11 : i64} {
  func.func @_custom_mu_kernel(%arg0: i32, %arg1: memref<8x32xf32, #tpu.memory_space<vmem>>, %arg2: memref<8x16xf32, #tpu.memory_space<vmem>>, %arg3: memref<8x16xf32, #tpu.memory_space<vmem>>, %arg4: memref<32x64xf32, #tpu.memory_space<vmem>>, %arg5: memref<1x64xf32, #tpu.memory_space<vmem>>, %arg6: memref<64x128xf32, #tpu.memory_space<vmem>>, %arg7: memref<1x32xf32, #tpu.memory_space<vmem>>, %arg8: memref<1x32xf32, #tpu.memory_space<vmem>>, %arg9: memref<8x128xf32, #tpu.memory_space<vmem>>) attributes {dimension_semantics = [#tpu.dimension_semantics<parallel>], iteration_bounds = array<i64: 1>, scalar_prefetch = 0 : i64, scratch_operands = 0 : i64, tpu.core_type = #tpu.core_type<tc>, window_params = [{transform_indices = @transform_0, window_bounds = array<i64: 8, 32>}, {transform_indices = @transform_1, window_bounds = array<i64: 8, 16>}, {transform_indices = @transform_2, window_bounds = array<i64: 8, 16>}, {pipeline_mode = #tpu.pipeline_mode<synchronous>, transform_indices = @transform_3, window_bounds = array<i64: 32, 64>}, {pipeline_mode = #tpu.pipeline_mode<synchronous>, transform_indices = @transform_4, window_bounds = array<i64: 1, 64>}, {pipeline_mode = #tpu.pipeline_mode<synchronous>, transform_indices = @transform_5, window_bounds = array<i64: 64, 128>}, {pipeline_mode = #tpu.pipeline_mode<synchronous>, transform_indices = @transform_6, window_bounds = array<i64: 1, 32>}, {pipeline_mode = #tpu.pipeline_mode<synchronous>, transform_indices = @transform_7, window_bounds = array<i64: 1, 32>}, {transform_indices = @transform_8, window_bounds = array<i64: 8, 128>}]} {
    %c0 = arith.constant 0 : index
    %c0_0 = arith.constant 0 : index
    %0 = vector.load %arg1[%c0, %c0_0] : memref<8x32xf32, #tpu.memory_space<vmem>>, vector<8x32xf32>
    %c0_1 = arith.constant 0 : index
    %c0_2 = arith.constant 0 : index
    %1 = vector.load %arg4[%c0_1, %c0_2] : memref<32x64xf32, #tpu.memory_space<vmem>>, vector<32x64xf32>
    %cst = arith.constant dense<0.000000e+00> : vector<8x64xf32>
    %2 = tpu.matmul %0, %1, %cst {dimension_numbers = #tpu.dot_dimension_numbers<[1], [0], [0], [1], [0, 0, 1, 1], [], []>} : vector<8x32xf32>, vector<32x64xf32>, vector<8x64xf32> -> vector<8x64xf32>
    %c0_3 = arith.constant 0 : index
    %c0_4 = arith.constant 0 : index
    %3 = vector.load %arg5[%c0_3, %c0_4] : memref<1x64xf32, #tpu.memory_space<vmem>>, vector<1x64xf32>
    %4 = vector.broadcast %3 : vector<1x64xf32> to vector<8x64xf32>
    %5 = arith.addf %2, %4 : vector<8x64xf32>
    %6 = math.tanh %5 : vector<8x64xf32>
    %c0_5 = arith.constant 0 : index
    %c0_6 = arith.constant 0 : index
    %7 = vector.load %arg6[%c0_5, %c0_6] : memref<64x128xf32, #tpu.memory_space<vmem>>, vector<64x128xf32>
    %cst_7 = arith.constant dense<0.000000e+00> : vector<8x128xf32>
    %8 = tpu.matmul %6, %7, %cst_7 {dimension_numbers = #tpu.dot_dimension_numbers<[1], [0], [0], [1], [0, 0, 1, 1], [], []>} : vector<8x64xf32>, vector<64x128xf32>, vector<8x128xf32> -> vector<8x128xf32>
    %9 = vector.extract_strided_slice %8 {offsets = [0, 0], sizes = [8, 32], strides = [1, 1]} : vector<8x128xf32> to vector<8x32xf32>
    %10 = vector.extract_strided_slice %8 {offsets = [0, 32], sizes = [8, 16], strides = [1, 1]} : vector<8x128xf32> to vector<8x16xf32>
    %cst_8 = arith.constant dense<0.000000e+00> : vector<8xf32>
    %11 = vector.multi_reduction <add>, %9, %cst_8 [1] : vector<8x32xf32> to vector<8xf32>
    %12 = vector.shape_cast %11 : vector<8xf32> to vector<8x1xf32>
    %cst_9 = arith.constant 3.125000e-02 : f32
    %13 = vector.broadcast %cst_9 : f32 to vector<8x1xf32>
    %14 = arith.mulf %12, %13 : vector<8x1xf32>
    %15 = arith.mulf %9, %9 : vector<8x32xf32>
    %cst_10 = arith.constant dense<0.000000e+00> : vector<8xf32>
    %16 = vector.multi_reduction <add>, %15, %cst_10 [1] : vector<8x32xf32> to vector<8xf32>
    %17 = vector.shape_cast %16 : vector<8xf32> to vector<8x1xf32>
    %cst_11 = arith.constant 3.125000e-02 : f32
    %18 = vector.broadcast %cst_11 : f32 to vector<8x1xf32>
    %19 = arith.mulf %17, %18 : vector<8x1xf32>
    %20 = arith.mulf %14, %14 : vector<8x1xf32>
    %21 = arith.subf %19, %20 : vector<8x1xf32>
    %22 = vector.broadcast %14 : vector<8x1xf32> to vector<8x32xf32>
    %23 = arith.subf %9, %22 : vector<8x32xf32>
    %cst_12 = arith.constant 9.99999974E-6 : f32
    %24 = vector.broadcast %cst_12 : f32 to vector<8x1xf32>
    %25 = arith.addf %21, %24 : vector<8x1xf32>
    %26 = math.rsqrt %25 : vector<8x1xf32>
    %27 = vector.broadcast %26 : vector<8x1xf32> to vector<8x32xf32>
    %28 = arith.mulf %23, %27 : vector<8x32xf32>
    %c0_13 = arith.constant 0 : index
    %c0_14 = arith.constant 0 : index
    %29 = vector.load %arg7[%c0_13, %c0_14] : memref<1x32xf32, #tpu.memory_space<vmem>>, vector<1x32xf32>
    %30 = vector.broadcast %29 : vector<1x32xf32> to vector<8x32xf32>
    %31 = arith.mulf %28, %30 : vector<8x32xf32>
    %c0_15 = arith.constant 0 : index
    %c0_16 = arith.constant 0 : index
    %32 = vector.load %arg8[%c0_15, %c0_16] : memref<1x32xf32, #tpu.memory_space<vmem>>, vector<1x32xf32>
    %33 = vector.broadcast %32 : vector<1x32xf32> to vector<8x32xf32>
    %34 = arith.addf %31, %33 : vector<8x32xf32>
    %c0_17 = arith.constant 0 : index
    %c0_18 = arith.constant 0 : index
    %35 = vector.load %arg2[%c0_17, %c0_18] : memref<8x16xf32, #tpu.memory_space<vmem>>, vector<8x16xf32>
    %c0_19 = arith.constant 0 : index
    %c0_20 = arith.constant 0 : index
    %36 = vector.load %arg3[%c0_19, %c0_20] : memref<8x16xf32, #tpu.memory_space<vmem>>, vector<8x16xf32>
    %37 = arith.negf %10 : vector<8x16xf32>
    %38 = math.exp %37 : vector<8x16xf32>
    %cst_21 = arith.constant 1.000000e+00 : f32
    %39 = vector.broadcast %cst_21 : f32 to vector<8x16xf32>
    %40 = arith.addf %39, %38 : vector<8x16xf32>
    %41 = arith.divf %39, %40 : vector<8x16xf32>
    %42 = arith.subf %35, %36 : vector<8x16xf32>
    %43 = arith.mulf %41, %42 : vector<8x16xf32>
    %44 = arith.addf %36, %43 : vector<8x16xf32>
    %c0_22 = arith.constant 0 : index
    %c0_23 = arith.constant 0 : index
    %45 = vector.load %arg9[%c0_22, %c0_23] : memref<8x128xf32, #tpu.memory_space<vmem>>, vector<8x16xf32>
    tpu.vector_store %arg9[%c0_22, %c0_23], %44 {strides = array<i32>} : memref<8x128xf32, #tpu.memory_space<vmem>>, vector<8x16xf32>,
    %c0_24 = arith.constant 0 : index
    %c16 = arith.constant 16 : index
    %46 = vector.load %arg9[%c0_24, %c16] : memref<8x128xf32, #tpu.memory_space<vmem>>, vector<8x32xf32>
    tpu.vector_store %arg9[%c0_24, %c16], %34 {strides = array<i32>} : memref<8x128xf32, #tpu.memory_space<vmem>>, vector<8x32xf32>,
    %cst_25 = arith.constant 0.000000e+00 : f32
    %47 = vector.broadcast %cst_25 : f32 to vector<8x80xf32>
    %c0_26 = arith.constant 0 : index
    %c48 = arith.constant 48 : index
    %48 = vector.load %arg9[%c0_26, %c48] : memref<8x128xf32, #tpu.memory_space<vmem>>, vector<8x80xf32>
    tpu.vector_store %arg9[%c0_26, %c48], %47 {strides = array<i32>} : memref<8x128xf32, #tpu.memory_space<vmem>>, vector<8x80xf32>,
    return
  }
  func.func @transform_0(%arg0: i32) -> (i32, i32) {
    %c0_i32 = arith.constant 0 : i32
    %c0_i32_0 = arith.constant 0 : i32
    return %arg0, %c0_i32 : i32, i32
  }
  func.func @transform_1(%arg0: i32) -> (i32, i32) {
    %c0_i32 = arith.constant 0 : i32
    %c0_i32_0 = arith.constant 0 : i32
    return %arg0, %c0_i32 : i32, i32
  }
  func.func @transform_2(%arg0: i32) -> (i32, i32) {
    %c0_i32 = arith.constant 0 : i32
    %c0_i32_0 = arith.constant 0 : i32
    return %arg0, %c0_i32 : i32, i32
  }
  func.func @transform_3(%arg0: i32) -> (i32, i32) {
    %c0_i32 = arith.constant 0 : i32
    %c0_i32_0 = arith.constant 0 : i32
    %c0_i32_1 = arith.constant 0 : i32
    return %c0_i32, %c0_i32_0 : i32, i32
  }
  func.func @transform_4(%arg0: i32) -> (i32, i32) {
    %c0_i32 = arith.constant 0 : i32
    %c0_i32_0 = arith.constant 0 : i32
    %c0_i32_1 = arith.constant 0 : i32
    return %c0_i32, %c0_i32_0 : i32, i32
  }
  func.func @transform_5(%arg0: i32) -> (i32, i32) {
    %c0_i32 = arith.constant 0 : i32
    %c0_i32_0 = arith.constant 0 : i32
    %c0_i32_1 = arith.constant 0 : i32
    return %c0_i32, %c0_i32_0 : i32, i32
  }
  func.func @transform_6(%arg0: i32) -> (i32, i32) {
    %c0_i32 = arith.constant 0 : i32
    %c0_i32_0 = arith.constant 0 : i32
    %c0_i32_1 = arith.constant 0 : i32
    return %c0_i32, %c0_i32_0 : i32, i32
  }
  func.func @transform_7(%arg0: i32) -> (i32, i32) {
    %c0_i32 = arith.constant 0 : i32
    %c0_i32_0 = arith.constant 0 : i32
    %c0_i32_1 = arith.constant 0 : i32
    return %c0_i32, %c0_i32_0 : i32, i32
  }
  func.func @transform_8(%arg0: i32) -> (i32, i32) {
    %c0_i32 = arith.constant 0 : i32
    %c0_i32_0 = arith.constant 0 : i32
    return %arg0, %c0_i32 : i32, i32
  }
}

</mosaic_0001>

<bundles_post_ra>
// kernel: tpu_custom_call.1
= control target key start
LH: loop header
LB: loop body
LE: loop exit
PB: predicated region body
PF: predicated region fallthrough
CT: control target
= control target key end

     0   :  { %13 = vsyncpa [#allocation3], 0  ;;  %s727_s0 = inlined_call_operand.hbm [shape: f32[8,32], index: 0, kind: input, shape index: {}]   ;;  %s728_s1 = inlined_call_operand.hbm [shape: f32[8,16], index: 1, kind: input, shape index: {}]   ;;  %s729_s2 = inlined_call_operand.hbm [shape: f32[8,16], index: 2, kind: input, shape index: {}]   ;;  %s730_s3 = inlined_call_operand.hbm [shape: f32[32,64], index: 3, kind: input, shape index: {}]   ;;  %s731_s4 = inlined_call_operand.vmem [shape: f32[1,64], index: 4, kind: input, shape index: {}]   ;;  %s732_s5 = inlined_call_operand.hbm [shape: f32[64,128], index: 5, kind: input, shape index: {}]   ;;  %s733_s6 = inlined_call_operand.vmem [shape: f32[1,32], index: 6, kind: input, shape index: {}]   ;;  %s734_s7 = inlined_call_operand.vmem [shape: f32[1,32], index: 7, kind: input, shape index: {}]   ;;  %s735_s8 = inlined_call_operand.hbm [shape: f32[8,128], index: 8, kind: output, shape index: {}]  }
   0x1   :  { %14 = vsyncpa [#allocation6], 0 }
   0x2   :  { %15 = vsyncpa [#allocation9], 0 }
   0x3   :  { %16 = vsyncpa [#allocation4], 0  ;;  %s568_s27 = smov [#allocation5]   ;;  %s569_s29 = smov [#allocation8]  }
   0x4   :  { %s33_s28 = sshll.u32 %s568_s27, 4  ;;  %s52_s30 = sshll.u32 %s569_s29, 4  ;;  %s34_s28 = int_to_ptr.vmem [resolvable:$true] %s33_s28  ;;  %s627_s30 = int_to_ptr.vmem [resolvable:$true] %s52_s30 }
   0x5   :  { %s428_s11 = scalar_lea.hbm %s728_s1, 128 }
   0x6   :  { %p429_p0 = scmp.ne.s32.totalorder %s728_s1, %s428_s11  ;;  %p432_p1 = scmp.lt.u32.totalorder %s428_s11, %s728_s1 }
   0x8   :  { %p434_p2 = pnand %p432_p1, %p429_p0 }
   0xa   :  { %437 = shalt.err (!%p434_p2)
}
   0xb   :  { %s438_s16 = scalar_lea.vmem %s34_s28, 128  ;;  %p443_p4 = scmp.lt.s32.totalorder %s34_s28, %s34_s28 }
   0xc   :  { %p439_p3 = scmp.ne.s32.totalorder %s34_s28, %s438_s16  ;;  %p444_p5 = scmp.lt.s32.totalorder %s438_s16, %s438_s16 }
   0xe   :  { %p445_p6 = por %p444_p5, %p443_p4 }
  0x10   :  { %p446_p7 = pnand %p445_p6, %p439_p3 }
  0x12   :  { %449 = shalt.err (!%p446_p7)
}
  0x13   :  { %36 = dma.hbm_to_vmem [thread:$0]  %s728_s1, 128, %s34_s28, [#allocation6]  }
  0x14   :  { %s450_s21 = scalar_lea.hbm %s730_s3, 512 }
  0x15   :  { %p451_p8 = scmp.ne.s32.totalorder %s730_s3, %s450_s21  ;;  %p454_p9 = scmp.lt.u32.totalorder %s450_s21, %s730_s3 }
  0x17   :  { %p456_p10 = pnand %p454_p9, %p451_p8 }
  0x19   :  { %459 = shalt.err (!%p456_p10)
}
  0x1a   :  { %s460_s26 = scalar_lea.vmem %s627_s30, 512  ;;  %p465_p12 = scmp.lt.s32.totalorder %s627_s30, %s627_s30 }
  0x1b   :  { %p461_p11 = scmp.ne.s32.totalorder %s627_s30, %s460_s26  ;;  %p466_p13 = scmp.lt.s32.totalorder %s460_s26, %s460_s26 }
  0x1d   :  { %p467_p0 = por %p466_p13, %p465_p12 }
  0x1f   :  { %p468_p1 = pnand %p467_p0, %p461_p11 }
  0x21   :  { %471 = shalt.err (!%p468_p1)
}
  0x22   :  { %s570_s1 = smov 128   ;;  %s571_s27 = smov 8  }
  0x23   :  { %58 = dma.hbm_to_vmem [thread:$0]  %s730_s3, 512, %s627_s30, [#allocation9], %s570_s1, %s570_s1, %s571_s27  }
  0x24   :  { %s572_s9 = smov [#allocation2]   ;;  %s573_s11 = smov [#allocation7]  }
  0x25   :  { %s23_s10 = sshll.u32 %s572_s9, 4  ;;  %s43_s12 = sshll.u32 %s573_s11, 4  ;;  %s24_s10 = int_to_ptr.vmem [resolvable:$true] %s23_s10  ;;  %s44_s12 = int_to_ptr.vmem [resolvable:$true] %s43_s12 }
  0x26   :  { %s472_s15 = scalar_lea.hbm %s727_s0, 128 }
  0x27   :  { %p473_p2 = scmp.ne.s32.totalorder %s727_s0, %s472_s15  ;;  %p476_p3 = scmp.lt.u32.totalorder %s472_s15, %s727_s0 }
  0x29   :  { %p478_p4 = pnand %p476_p3, %p473_p2 }
  0x2b   :  { %481 = shalt.err (!%p478_p4)
}
  0x2c   :  { %s482_s3 = scalar_lea.vmem %s24_s10, 128  ;;  %p487_p6 = scmp.lt.s32.totalorder %s24_s10, %s24_s10 }
  0x2d   :  { %p483_p5 = scmp.ne.s32.totalorder %s24_s10, %s482_s3  ;;  %p488_p7 = scmp.lt.s32.totalorder %s482_s3, %s482_s3 }
  0x2f   :  { %p489_p8 = por %p488_p7, %p487_p6 }
  0x31   :  { %p490_p9 = pnand %p489_p8, %p483_p5 }
  0x33   :  { %493 = shalt.err (!%p490_p9)
}
  0x34   :  { %26 = dma.hbm_to_vmem [thread:$0]  %s727_s0, 128, %s24_s10, [#allocation3]  }
  0x35   :  { %s494_s23 = scalar_lea.hbm %s729_s2, 128 }
  0x36   :  { %p495_p10 = scmp.ne.s32.totalorder %s729_s2, %s494_s23  ;;  %p498_p11 = scmp.lt.u32.totalorder %s494_s23, %s729_s2 }
  0x38   :  { %p500_p12 = pnand %p498_p11, %p495_p10 }
  0x3a   :  { %503 = shalt.err (!%p500_p12)
}
  0x3b   :  { %s504_s29 = scalar_lea.vmem %s44_s12, 128  ;;  %p509_p0 = scmp.lt.s32.totalorder %s44_s12, %s44_s12 }
  0x3c   :  { %p505_p13 = scmp.ne.s32.totalorder %s44_s12, %s504_s29  ;;  %p510_p1 = scmp.lt.s32.totalorder %s504_s29, %s504_s29 }
  0x3e   :  { %p511_p2 = por %p510_p1, %p509_p0 }
  0x40   :  { %p512_p3 = pnand %p511_p2, %p505_p13 }
  0x42   :  { %515 = shalt.err (!%p512_p3)
}
  0x43   :  { %46 = dma.hbm_to_vmem [thread:$0]  %s729_s2, 128, %s44_s12, [#allocation6]  }
  0x44   :  { %s574_s10 = smov [#allocation10]   ;;  %s516_s15 = scalar_lea.hbm %s732_s5, 1024 }
  0x45   :  { %s66_s11 = sshll.u32 %s574_s10, 4  ;;  %p517_p4 = scmp.ne.s32.totalorder %s732_s5, %s516_s15  ;;  %s67_s11 = int_to_ptr.vmem [resolvable:$true] %s66_s11 }
  0x46   :  { %p520_p5 = scmp.lt.u32.totalorder %s516_s15, %s732_s5 }
  0x48   :  { %p522_p6 = pnand %p520_p5, %p517_p4 }
  0x4a   :  { %525 = shalt.err (!%p522_p6)
}
  0x4b   :  { %s526_s3 = scalar_lea.vmem %s67_s11, 1024  ;;  %p531_p8 = scmp.lt.s32.totalorder %s67_s11, %s67_s11 }
  0x4c   :  { %p527_p7 = scmp.ne.s32.totalorder %s67_s11, %s526_s3  ;;  %p532_p9 = scmp.lt.s32.totalorder %s526_s3, %s526_s3 }
  0x4e   :  { %p533_p10 = por %p532_p9, %p531_p8 }
  0x50   :  { %p534_p11 = pnand %p533_p10, %p527_p7 }
  0x52   :  { %537 = shalt.err (!%p534_p11)
}
  0x53   :  { %72 = dma.hbm_to_vmem [thread:$0]  %s732_s5, 1024, %s67_s11, [#allocation9], %s570_s1, %s570_s1, %s571_s27  }
  0x54   :  { %560 = dma.done.wait [#allocation3], 128  }
  0x55   :  { %561 = vsyncadd [#allocation3], 4294967168 }
  0x56   :  { %562 = dma.done.wait [#allocation6], 256  }
  0x57   :  { %563 = vsyncadd [#allocation6], 4294967040 }
  0x58   :  { %564 = dma.done.wait [#allocation9], 1536  }
  0x59   :  { %565 = vsyncadd [#allocation9], 4294965760  ;;  %v575_v0 = vmov 0.0|0.0   ;;  %vm576_vm0 = vmmov 0   ;;  %v577_v1 = vmov 0.0   ;;  %v93_v2 = vld [vmem:[#allocation8] sm:$0xff] }
  0x5a   :  { %388 = vmatprep.subr.bf16.mxu0 %v575_v0  ;;  %366 = vmatprep.mubr.msk.f32.mxu0 %vm576_vm0, %v577_v1  ;;  %v94_v3 = vld [vmem:[#allocation8 + $0x8] sm:$0xff]  ;;  %v95_v4 = vld [vmem:[#allocation8 + $0x10] sm:$0xff]  ;;  %v96_v6 = vld [vmem:[#allocation8 + $0x18] sm:$0xff]  ;;  %vm104_vm1 = vcmask 261120   ;;  %s578_s5 = smov 32   ;;  %vm187_vm2 = vcmask 523264  }
  0x5b   :  { %394 = vmatprep.subr.bf16.mxu1 %v575_v0  ;;  %385 = vmatprep.mubr.msk.f32.mxu1 %vm576_vm0, %v577_v1  ;;  %v389_v5 = vpack.c.bf16 %v94_v3, %v93_v2  ;;  %v179_v7 = vld [vmem:[#allocation10] sm:$0xff]  ;;  %v180_v8 = vld [vmem:[#allocation10 + $0x8] sm:$0xff]  ;;  %v392_v9 = vpack.c.bf16 %v96_v6, %v95_v4  ;;  %v181_v12 = vld [vmem:[#allocation10 + $0x10] sm:$0xff]  ;;  %vm311_vm3 = vcmask 130048   ;;  %s580_s23 = smov 16   ;;  %s581_s24 = smov [#allocation11]  }
  0x5c   :  { %v395_v10 = vpack.c.bf16 %v180_v8, %v179_v7  ;;  %v92_v11 = vld [vmem:[#allocation2] sm:$0xff]  ;;  %v182_v13 = vld [vmem:[#allocation10 + $0x18] sm:$0xff]  ;;  %v183_v15 = vld [vmem:[#allocation10 + $0x20] sm:$0xff]  ;;  %s327_s25 = sshll.u32 %s581_s24, 4  ;;  %vm317_vm4 = vcmask 392320   ;;  %vm319_vm5 = vcmask 1047936   ;;  %s328_s25 = int_to_ptr.vmem [resolvable:$true] %s327_s25 }
  0x5d   :  { %390 = vmatpush3.bf16.msra.mxu0 %v389_v5  ;;  %v398_v14 = vpack.c.bf16 %v182_v13, %v181_v12  ;;  %v184_v16 = vld [vmem:[#allocation10 + $0x28] sm:$0xff]  ;;  %v185_v18 = vld [vmem:[#allocation10 + $0x30] sm:$0xff]  ;;  %v186_v19 = vld [vmem:[#allocation10 + $0x38] sm:$0xff]  ;;  %s538_s26 = scalar_lea.vmem %s328_s25, 128  ;;  %p543_p13 = scmp.lt.s32.totalorder %s328_s25, %s328_s25 }
  0x5e   :  { %391 = vmatprep.subr.bf16.mxu0 %v575_v0  ;;  %396 = vmatpush3.bf16.msra.mxu1 %v395_v10  ;;  %v401_v17 = vpack.c.bf16 %v184_v16, %v183_v15  ;;  %v404_v20 = vpack.c.bf16 %v186_v19, %v185_v18  ;;  %v292_v21 = vld [vmem:[#allocation5] sm:$0xff]  ;;  %v293_v22 = vld [vmem:[#allocation7] sm:$0xff]  ;;  %v338_v24 = vld [vmem:[%s731_s4] ss:$0 sm:$0xff]  ;;  %s579_s4 = smov 96   ;;  %p539_p12 = scmp.ne.s32.totalorder %s328_s25, %s538_s26 }
  0x5f   :  { %397 = vmatprep.subr.bf16.mxu1 %v575_v0  ;;  %v300_v23 = vsub.f32 %v292_v21, %v293_v22  ;;  %v341_v51 = vld [vmem:[%s733_s6] ss:$0 sm:$0xff]  ;;  %p544_p0 = scmp.lt.s32.totalorder %s538_s26, %s538_s26 }
  0x60   :  { %v342_v53 = vld [vmem:[%s734_s7] ss:$0 sm:$0xff] }
  0x61   :  { %393 = vmatpush3.bf16.msra.mxu0 %v392_v9  ;;  %302 = vrot.lane.b32.xlu1 %v300_v23, %s578_s5  ;;  %p545_p1 = por %p544_p0, %p543_p13 }
  0x62   :  { %399 = vmatpush3.bf16.msra.mxu1 %v398_v14 }
  0x63   :  { %400 = vmatprep.subr.bf16.mxu1 %v575_v0  ;;  %p546_p2 = pnand %p545_p1, %p539_p12 }
  0x64   :  { %367 = vmatmul.mubr.msk.f32.vlgmr.msra.gmra.mrb[0].mxu0 %vm104_vm1, %v92_v11 }
  0x66   :  { %402 = vmatpush3.bf16.msra.mxu1 %v401_v17 }
  0x67   :  { %403 = vmatprep.subr.bf16.mxu1 %v575_v0 }
  0x6a   :  { %405 = vmatpush3.bf16.msra.mxu1 %v404_v20 }
  0xd3   :  { %v303_v37 = vpop.permute.xlu1 %302 }
 0x137   :  { %v174_v25 = vpop.f32.mrb[0].mxu0 }
 0x138   :  { %v175_v26 = vadd.f32 %v338_v24, %v174_v25  ;;  %v368_v27 = vpop.f32.mrb[1].mxu0 }
 0x13a   :  { %420 = vtanh.f32 %v175_v26 }
 0x144   :  { %v421_v28 = vpop.eup %420 }
 0x145   :  { %386 = vmatmul.mubr.msk.f32.vlgmr.msra.gmra.mrb[0].mxu1 %vm187_vm2, %v421_v28 }
 0x218   :  { %v257_v29 = vpop.f32.mrb[0].mxu1 }
 0x219   :  { %v343_v30 = vmul.f32 -1.442695, %v257_v29  ;;  %v387_v31 = vpop.f32.mrb[1].mxu1  ;;  %v261_v32 = vsel %vm104_vm1, %v257_v29, 0.0  ;;  %v265_v33 = vmul.f32 %v257_v29, %v257_v29 }
 0x21a   :  { %262 = vadd.xlane.f32.xlu0 %v261_v32 }
 0x21b   :  { %422 = vpow2.f32 %v343_v30  ;;  %v266_v34 = vsel %vm104_vm1, %v265_v33, 0.0 }
 0x21e   :  { %267 = vadd.xlane.f32.xlu0 %v266_v34 }
 0x225   :  { %v423_v35 = vpop.eup %422 }
 0x226   :  { %v297_v36 = vadd.f32 1.0, %v423_v35 }
 0x228   :  { %424 = vrcp.f32 %v297_v36 }
 0x232   :  { %v425_v38 = vpop.eup %424 }
 0x233   :  { %v305_v39 = vmul.f32 %v425_v38, %v303_v37 }
 0x235   :  { %307 = vrot.lane.b32.xlu1 %v305_v39, %s579_s4 }
 0x2a7   :  { %v308_v40 = vpop.permute.xlu1 %307  ;;  %v263_v41 = vpop.xlane.xlu0 %262 }
 0x2a8   :  { %v310_v42 = vadd.f32 %v308_v40, %v293_v22  ;;  %v264_v43 = vmul.f32 0.03125, %v263_v41 }
 0x2aa   :  { %312 = vst.msk [vmem:[#allocation11] sm:$0xff] %vm311_vm3, %v310_v42  ;;  %v270_v45 = vmul.f32 %v264_v43, %v264_v43  ;;  %v272_v49 = vsub.f32 %v257_v29, %v264_v43 }
 0x2ab   :  { %v268_v44 = vpop.xlane.xlu0 %267 }
 0x2ac   :  { %v269_v46 = vmul.f32 0.03125, %v268_v44 }
 0x2ae   :  { %v271_v47 = vsub.f32 %v269_v46, %v270_v45 }
 0x2b0   :  { %v273_v48 = vadd.f32 1e-05, %v271_v47 }
 0x2b2   :  { %426 = vrsqrt.f32 %v273_v48 }
 0x2bc   :  { %v427_v50 = vpop.eup %426 }
 0x2bd   :  { %v275_v52 = vmul.f32 %v427_v50, %v272_v49 }
 0x2bf   :  { %v283_v54 = vmul.f32 %v341_v51, %v275_v52 }
 0x2c1   :  { %v291_v55 = vadd.f32 %v342_v53, %v283_v54 }
 0x2c3   :  { %314 = vrot.lane.b32.xlu0 %v291_v55, %s580_s23 }
 0x335   :  { %v315_v56 = vpop.permute.xlu0 %314 }
 0x336   :  { %318 = vst.msk [vmem:[#allocation11] sm:$0xff] %vm317_vm4, %v315_v56 }
 0x337   :  { %320 = vst.msk [vmem:[#allocation11] sm:$0xff] %vm319_vm5, %v577_v1 }
 0x338   :  { %549 = shalt.err (!%p546_p2)
}
 0x339   :  { %s550_s28 = scalar_lea.hbm %s735_s8, 128 }
 0x33a   :  { %p551_p3 = scmp.ne.s32.totalorder %s735_s8, %s550_s28  ;;  %p554_p4 = scmp.lt.u32.totalorder %s550_s28, %s735_s8 }
 0x33c   :  { %p556_p5 = pnand %p554_p4, %p551_p3 }
 0x33e   :  { %559 = shalt.err (!%p556_p5)
}
 0x33f   :  { %330 = dma.vmem_to_hbm [thread:$0]  %s328_s25, 128, %s735_s8, [#allocation4]  }
 0x340   :  { %566 = dma.done.wait [#allocation4], 128  }
 0x341   :  { %567 = vsyncadd [#allocation4], 4294967168 }
 0x342   :  { %334 = vsyncpa [#allocation3], 1 }
 0x343   :  { %335 = vsyncpa [#allocation6], 1 }
 0x344   :  { %336 = vsyncpa [#allocation9], 1 }
 0x345   :  { %337 = vsyncpa [#allocation4], 1 }

</bundles_post_ra>
